<compile_context>
chip_gen: v7x
topology: tpu7x:2x2x1
jax: 0.10.0
libtpu: 0.0.40
codegen_flags: <defaults>
</compile_context>

<pallas_src>
import functools

import jax
import jax.numpy as jnp
from jax.experimental import pallas as pl
from jax.experimental.pallas import tpu as pltpu


def _round_up(x, n):
    return ((x + n - 1) // n) * n


def _sublane_multiple(dtype):
    # Rows per (8,128) tile second-to-last dim: f32 -> 8, bf16 -> 16, int8/fp8 -> 32.
    return {4: 8, 2: 16, 1: 32}[jnp.dtype(dtype).itemsize]


def _vmem_capacity_bytes():
    try:
        return int(pltpu.get_tpu_info().vmem_capacity_bytes)
    except Exception:
        return 64 << 20  # conservative fallback: v7x per-TensorCore VMEM


def _unembed_kernel(x_ref, w_ref, b_ref, o_ref, acc_ref, *, d_model, tk, mask_k):
    # x_ref: (tm, tk)   w_ref: (tk, tn)   b_ref: (1, tn)
    # o_ref: (tm, tn)   acc_ref: (tm, tn) f32 scratch, resident across the K axis.
    k = pl.program_id(2)

    @pl.when(k == 0)
    def _():
        acc_ref[...] = jnp.zeros_like(acc_ref)

    x = x_ref[...]
    w = w_ref[...]
    if mask_k:
        # d_model is not a multiple of tk: zero the out-of-range K tail of the
        # last block so garbage from the partial DMA never reaches real outputs.
        valid = d_model - k * tk
        kx = jax.lax.broadcasted_iota(jnp.int32, x.shape, 1)
        x = jnp.where(kx < valid, x, jnp.zeros_like(x))
        kw = jax.lax.broadcasted_iota(jnp.int32, w.shape, 0)
        w = jnp.where(kw < valid, w, jnp.zeros_like(w))

    acc_ref[...] += jnp.dot(x, w, preferred_element_type=jnp.float32)

    @pl.when(k == pl.num_programs(2) - 1)
    def _():
        # Bias added exactly once, in f32, before the downcast.
        o_ref[...] = (acc_ref[...] + b_ref[...].astype(jnp.float32)).astype(o_ref.dtype)


@functools.partial(jax.jit, static_argnames=("tm", "tn", "tk"))
def unembed(x, w_u, b_u, *, tm=None, tn=None, tk=None):
    """x: [batch, position, d_model], w_u: [d_model, d_vocab], b_u: [d_vocab]."""
    batch, position, d_model = x.shape
    d_model_w, d_vocab = w_u.shape
    assert d_model_w == d_model
    m = batch * position
    out_dtype = x.dtype

    xb = jnp.dtype(x.dtype).itemsize
    wb = jnp.dtype(w_u.dtype).itemsize
    bb = jnp.dtype(b_u.dtype).itemsize
    ob = jnp.dtype(out_dtype).itemsize

    # --- per-generation VMEM budget (leave headroom for internal scratch) ---
    cap = _vmem_capacity_bytes()
    budget = cap - max(12 << 20, cap // 4)       # ~48 MiB on v7x, ~96 MiB on v5e/v6e

    if tm is None:
        tm = 512
    if tn is None:
        tn = 1024 if cap >= (100 << 20) else 512

    # --- tile sizes ----------------------------------------------------------
    m_align = max(_sublane_multiple(x.dtype), _sublane_multiple(out_dtype))
    # Balanced M tiles: m = tm+1 must not produce a ~100%-padded second tile.
    nm = max(1, pl.cdiv(m, tm))
    tm_eff = min(_round_up(pl.cdiv(m, nm), m_align), _round_up(m, m_align))

    tn_eff = min(_round_up(tn, 128), _round_up(d_vocab, 128))   # lane axis: x128

    if tk is not None and tk < d_model:
        tk_eff = min(d_model, max(128, _round_up(tk, 128)))
    else:
        tk_eff = d_model
    if tk_eff >= d_model:
        tk_eff = d_model

    def footprint(tm_, tn_, tk_):
        return (2 * tm_ * tk_ * xb          # x tile (double-buffered)
                + 2 * tk_ * tn_ * wb        # W_U tile (dominant HBM stream)
                + 2 * tn_ * bb              # bias tile
                + 2 * tm_ * tn_ * ob        # output tile
                + tm_ * tn_ * 4)            # f32 accumulator scratch

    # Shrink to fit the VMEM budget: split K first (bounds footprint independent
    # of d_model), then the vocab tile, then the M tile.
    while footprint(tm_eff, tn_eff, tk_eff) > budget:
        if tk_eff > 512:
            tk_eff = max(512, _round_up(tk_eff // 2, 128))
        elif tn_eff > 256:
            tn_eff = max(256, tn_eff // 2)
        elif tm_eff > 2 * m_align:
            tm_eff = max(m_align, _round_up(tm_eff // 2, m_align))
        else:
            break

    grid = (pl.cdiv(m, tm_eff), pl.cdiv(d_vocab, tn_eff), pl.cdiv(d_model, tk_eff))
    ni, nj, nk = grid
    mask_k = (d_model % tk_eff) != 0

    # No padding or post-slicing: ragged tails use partial (non-divisible) blocks.
    x2d = x.reshape(m, d_model)
    b2d = b_u.reshape(1, d_vocab)

    vmem_limit = int(min(budget,
                         max(footprint(tm_eff, tn_eff, tk_eff) + (4 << 20), 32 << 20)))

    # Bytes as actually streamed: W_U is re-read once per M tile; x is read once
    # when K is unsplit (resident across the vocab sweep), else once per vocab tile.
    cost = pl.CostEstimate(
        flops=2 * m * d_model * d_vocab,
        transcendentals=0,
        bytes_accessed=int(
            x2d.size * xb * (1 if nk == 1 else nj)
            + w_u.size * wb * ni
            + b2d.size * bb * ni
            + m * d_vocab * ob
        ),
    )

    kernel = functools.partial(_unembed_kernel, d_model=d_model, tk=tk_eff, mask_k=mask_k)

    out2d = pl.pallas_call(
        kernel,
        out_shape=jax.ShapeDtypeStruct((m, d_vocab), out_dtype),
        grid_spec=pltpu.PrefetchScalarGridSpec(
            num_scalar_prefetch=0,
            grid=grid,
            in_specs=[
                # x tile: block index constant across the vocab sweep when nk == 1.
                pl.BlockSpec((tm_eff, tk_eff), lambda i, j, k: (i, k)),
                # W_U tile: the dominant (streamed) HBM traffic.
                pl.BlockSpec((tk_eff, tn_eff), lambda i, j, k: (k, j)),
                # Bias vocab tile.
                pl.BlockSpec((1, tn_eff), lambda i, j, k: (0, j)),
            ],
            out_specs=pl.BlockSpec((tm_eff, tn_eff), lambda i, j, k: (i, j)),
            scratch_shapes=[pltpu.VMEM((tm_eff, tn_eff), jnp.float32)],
        ),
        compiler_params=pltpu.CompilerParams(
            dimension_semantics=("parallel", "parallel", "arbitrary"),
            vmem_limit_bytes=vmem_limit,
        ),
        cost_estimate=cost,
    )(x2d, w_u, b2d)

    return out2d.reshape(batch, position, d_vocab)


if __name__ == "__main__":
    init_range = 0.02

    def ref_unembed(xa, wa, ba):
        return jnp.einsum("bpd,dv->bpv", xa, wa) + ba

    # Case 1: aligned shapes (Config-style, scaled down), zero bias.
    batch, position, d_model, d_vocab = 2, 8, 256, 1024
    k0, k1 = jax.random.split(jax.random.PRNGKey(0))
    x = jax.random.normal(k0, (batch, position, d_model), dtype=jnp.float32)
    w_u = init_range * jax.random.normal(k1, (d_model, d_vocab), dtype=jnp.float32)
    b_u = jnp.zeros((d_vocab,), dtype=jnp.float32)
    logits = unembed(x, w_u, b_u)
    jax.block_until_ready(logits)
    assert logits.shape == (batch, position, d_vocab)
    assert jnp.allclose(logits, ref_unembed(x, w_u, b_u), atol=2e-3, rtol=2e-3)

    # Case 2: ragged M and d_vocab (no padding copies), non-zero bias.
    k2, k3, k4 = jax.random.split(jax.random.PRNGKey(1), 3)
    x2 = jax.random.normal(k2, (1, 5, 24), dtype=jnp.float32)
    w2 = init_range * jax.random.normal(k3, (24, 200), dtype=jnp.float32)
    bias2 = 0.1 * jax.random.normal(k4, (200,), dtype=jnp.float32)
    out2 = unembed(x2, w2, bias2)
    jax.block_until_ready(out2)
    assert out2.shape == (1, 5, 200)
    assert jnp.allclose(out2, ref_unembed(x2, w2, bias2), atol=2e-3, rtol=2e-3)

    # Case 3: forced K-split with a ragged d_model tail (exercises the
    # accumulator + tail-masking path).
    k5, k6, k7 = jax.random.split(jax.random.PRNGKey(2), 3)
    x3 = jax.random.normal(k5, (2, 8, 1000), dtype=jnp.float32)
    w3 = init_range * jax.random.normal(k6, (1000, 512), dtype=jnp.float32)
    bias3 = 0.05 * jax.random.normal(k7, (512,), dtype=jnp.float32)
    out3 = unembed(x3, w3, bias3, tk=512)
    jax.block_until_ready(out3)
    assert out3.shape == (2, 8, 512)
    assert jnp.allclose(out3, ref_unembed(x3, w3, bias3), atol=5e-3, rtol=5e-3)

    # Case 4: bf16 activations/weights (16-row sublane alignment, ragged M).
    k8, k9 = jax.random.split(jax.random.PRNGKey(3))
    x4 = jax.random.normal(k8, (2, 9, 128), dtype=jnp.float32).astype(jnp.bfloat16)
    w4 = (init_range * jax.random.normal(k9, (128, 384), dtype=jnp.float32)).astype(jnp.bfloat16)
    bias4 = jnp.zeros((384,), dtype=jnp.float32)
    out4 = unembed(x4, w4, bias4)
    jax.block_until_ready(out4)
    ref4 = ref_unembed(x4.astype(jnp.float32), w4.astype(jnp.float32), bias4)
    assert out4.shape == (2, 9, 384)
    assert jnp.allclose(out4.astype(jnp.float32), ref4, atol=2e-2, rtol=2e-2)

    print("KERNEL_OK")
</pallas_src>

<mosaic_0001>
module attributes {stable_mosaic.version = 11 : i64} {
  func.func @_unembed_kernel(%arg0: i32, %arg1: i32, %arg2: i32, %arg3: memref<16x256xf32, #tpu.memory_space<vmem>>, %arg4: memref<256x512xf32, #tpu.memory_space<vmem>>, %arg5: memref<1x512xf32, #tpu.memory_space<vmem>>, %arg6: memref<16x512xf32, #tpu.memory_space<vmem>>, %arg7: memref<16x512xf32, #tpu.memory_space<vmem>>) attributes {dimension_semantics = [#tpu.dimension_semantics<parallel>, #tpu.dimension_semantics<parallel>, #tpu.dimension_semantics<arbitrary>], iteration_bounds = array<i64: 1, 2, 1>, scalar_prefetch = 0 : i64, scratch_operands = 1 : i64, tpu.core_type = #tpu.core_type<tc>, window_params = [{transform_indices = @transform_0, window_bounds = array<i64: 16, 256>}, {transform_indices = @transform_1, window_bounds = array<i64: 256, 512>}, {transform_indices = @transform_2, window_bounds = array<i64: 1, 512>}, {transform_indices = @transform_3, window_bounds = array<i64: 16, 512>}]} {
    %c0_i32 = arith.constant 0 : i32
    %0 = arith.cmpi eq, %arg2, %c0_i32 : i32
    %1 = arith.extui %0 : i1 to i32
    %c0_i32_0 = arith.constant 0 : i32
    %2 = arith.cmpi ne, %1, %c0_i32_0 : i32
    scf.if %2 {
      %cst_10 = arith.constant 0.000000e+00 : f32
      %12 = vector.broadcast %cst_10 : f32 to vector<16x512xf32>
      %c0_11 = arith.constant 0 : index
      %c0_12 = arith.constant 0 : index
      %13 = vector.load %arg7[%c0_11, %c0_12] : memref<16x512xf32, #tpu.memory_space<vmem>>, vector<16x512xf32>
      tpu.vector_store %arg7[%c0_11, %c0_12], %12 {strides = array<i32>} : memref<16x512xf32, #tpu.memory_space<vmem>>, vector<16x512xf32>,
    } else {
    }
    %c0 = arith.constant 0 : index
    %c0_1 = arith.constant 0 : index
    %3 = vector.load %arg3[%c0, %c0_1] : memref<16x256xf32, #tpu.memory_space<vmem>>, vector<16x256xf32>
    %c0_2 = arith.constant 0 : index
    %c0_3 = arith.constant 0 : index
    %4 = vector.load %arg4[%c0_2, %c0_3] : memref<256x512xf32, #tpu.memory_space<vmem>>, vector<256x512xf32>
    %c0_4 = arith.constant 0 : index
    %c0_5 = arith.constant 0 : index
    %5 = vector.load %arg7[%c0_4, %c0_5] : memref<16x512xf32, #tpu.memory_space<vmem>>, vector<16x512xf32>
    %cst = arith.constant dense<0.000000e+00> : vector<16x512xf32>
    %6 = tpu.matmul %3, %4, %cst {dimension_numbers = #tpu.dot_dimension_numbers<[1], [0], [0], [1], [0, 0, 1, 1], [], []>} : vector<16x256xf32>, vector<256x512xf32>, vector<16x512xf32> -> vector<16x512xf32>
    %7 = arith.addf %5, %6 : vector<16x512xf32>
    %c0_6 = arith.constant 0 : index
    %c0_7 = arith.constant 0 : index
    %8 = vector.load %arg7[%c0_6, %c0_7] : memref<16x512xf32, #tpu.memory_space<vmem>>, vector<16x512xf32>
    tpu.vector_store %arg7[%c0_6, %c0_7], %7 {strides = array<i32>} : memref<16x512xf32, #tpu.memory_space<vmem>>, vector<16x512xf32>,
    %c0_i32_8 = arith.constant 0 : i32
    %9 = arith.cmpi eq, %arg2, %c0_i32_8 : i32
    %10 = arith.extui %9 : i1 to i32
    %c0_i32_9 = arith.constant 0 : i32
    %11 = arith.cmpi ne, %10, %c0_i32_9 : i32
    scf.if %11 {
      %c0_10 = arith.constant 0 : index
      %c0_11 = arith.constant 0 : index
      %12 = vector.load %arg7[%c0_10, %c0_11] : memref<16x512xf32, #tpu.memory_space<vmem>>, vector<16x512xf32>
      %c0_12 = arith.constant 0 : index
      %c0_13 = arith.constant 0 : index
      %13 = vector.load %arg5[%c0_12, %c0_13] : memref<1x512xf32, #tpu.memory_space<vmem>>, vector<1x512xf32>
      %14 = vector.broadcast %13 : vector<1x512xf32> to vector<16x512xf32>
      %15 = arith.addf %12, %14 : vector<16x512xf32>
      %c0_14 = arith.constant 0 : index
      %c0_15 = arith.constant 0 : index
      %16 = vector.load %arg6[%c0_14, %c0_15] : memref<16x512xf32, #tpu.memory_space<vmem>>, vector<16x512xf32>
      tpu.vector_store %arg6[%c0_14, %c0_15], %15 {strides = array<i32>} : memref<16x512xf32, #tpu.memory_space<vmem>>, vector<16x512xf32>,
    } else {
    }
    return
  }
  func.func @transform_0(%arg0: i32, %arg1: i32, %arg2: i32) -> (i32, i32) {
    %c0_i32 = arith.constant 0 : i32
    return %arg0, %arg2 : i32, i32
  }
  func.func @transform_1(%arg0: i32, %arg1: i32, %arg2: i32) -> (i32, i32) {
    %c0_i32 = arith.constant 0 : i32
    return %arg2, %arg1 : i32, i32
  }
  func.func @transform_2(%arg0: i32, %arg1: i32, %arg2: i32) -> (i32, i32) {
    %c0_i32 = arith.constant 0 : i32
    %c0_i32_0 = arith.constant 0 : i32
    return %c0_i32, %arg1 : i32, i32
  }
  func.func @transform_3(%arg0: i32, %arg1: i32, %arg2: i32) -> (i32, i32) {
    %c0_i32 = arith.constant 0 : i32
    return %arg0, %arg1 : i32, i32
  }
}

</mosaic_0001>

<bundles_post_ra>
// kernel: unembed.1
= control target key start
LH: loop header
LB: loop body
LE: loop exit
PB: predicated region body
PF: predicated region fallthrough
CT: control target
= control target key end

     0   :  { %8 = vsyncpa [#allocation4], 0  ;;  %s1533_s0 = inlined_call_operand.hbm [shape: f32[16,256], index: 0, kind: input, shape index: {}]   ;;  %s1534_s1 = inlined_call_operand.hbm [shape: f32[256,1024], index: 1, kind: input, shape index: {}]   ;;  %s1535_s2 = inlined_call_operand.vmem [shape: f32[1,1024], index: 2, kind: input, shape index: {}]   ;;  %s1536_s3 = inlined_call_operand.hbm [shape: f32[16,1024], index: 3, kind: output, shape index: {}]  }
   0x1   :  { %9 = vsyncpa [#allocation7], 0 }
   0x2   :  { %11 = vsyncpa [#allocation7 + $0x1], 0 }
   0x3   :  { %12 = vsyncpa [#allocation5], 0 }
   0x4   :  { %14 = vsyncpa [#allocation5 + $0x1], 0  ;;  %s1178_s12 = smov 0   ;;  %s1180_s13 = smov 0  }
   0x5   :  { %s1182_s14 = smov 0   ;;  %s1184_s15 = smov 0  }
   0x6   :  { %s1186_s16 = smov 0   ;;  %s1188_s17 = smov 0  }
   0x7 LB: > { %s772_s18 = sadd.s32 4294967295, %s1145_s17   ;;  %s773_s19 = sadd.s32 4294967294, %s1145_s17   ;;  %s1145_s17 = sphi %s1188_s17, %s20_s17   ;;  %s1141_s16 = sphi %s1186_s16, %s1562_s16   ;;  %s1137_s15 = sphi %s1184_s15, %s1561_s15   ;;  %s1133_s14 = sphi %s1182_s14, %s1560_s14   ;;  %s1129_s13 = sphi %s1180_s13, %s1559_s13   ;;  %s1125_s12 = sphi %s1178_s12, %s1558_s12  }
   0x8   : > { %p83_p0 = scmp.ne.s32.totalorder %s1133_s14, %s1129_s13  ;;  %p84_p1 = scmp.eq.s32.totalorder %s1145_s17, 0 }
   0x9   : > { %p89_p2 = scmp.ne.s32.totalorder %s1129_s13, %s1125_s12  ;;  %p1215_p3 = scmp.eq.s32.totalorder %s772_s18, 0 }
   0xa   : > { %p1219_p4 = por %p84_p1, %p83_p0  ;;  %p141_p5 = scmp.eq.s32.totalorder %s772_s18, 1 }
   0xb   : > { %s1543_s20 = scalar_select %p1215_p3, 1, 0 }
   0xc   : > { %p1225_p6 = por %p1215_p3, %p89_p2  ;;  %p147_p7 = scmp.eq.s32.totalorder %s773_s19, 1 }
   0xd   : > { %p1229_p8 = por %p141_p5, %p83_p0  ;;  %p774_p9 = scmp.ge.s32.totalorder %s1145_s17, 1 }
   0xe   : > { %s1545_s22 = scalar_select %p1225_p6, 1, 0 }
   0xf   : > { %s1546_s23 = scalar_select %p1229_p8, 1, 0 }
  0x10   : > { %p1234_p10 = por %p147_p7, %p89_p2  ;;  %p154_p11 = scmp.lt.s32.totalorder %s1145_s17, 3 }
  0x11   : > { %s1147_s26 = smov [#allocation3]   ;;  %p941_p1 = scmp.lt.s32.totalorder %s1145_s17, 2 }
  0x12   : > { %s1547_s24 = scalar_select %p1234_p10, 1, 0 }
  0x13   : > { %p1239_p12 = pnand %p774_p9, %p154_p11  ;;  %s172_s27 = sshll.u32 %s1147_s26, 4  ;;  %s1243_s27 = int_to_ptr.vmem [resolvable:$true] %s172_s27 }
  0x14   : > { %p1257_p2 = pnand %p941_p1, %p1219_p4  ;;  %s35_s30 = sadd.s32 1, %s1141_s16 }
  0x15   : > { %s1548_s25 = scalar_select %p1239_p12, 1, 0 }
  0x16   : > { %p928_p13 = pneg %p1239_p12  ;;  %s1001_s6 = scalar_lea.hbm %s1533_s0, 512 }
  0x17   : > { %s1550_s29 = scalar_select %p1257_p2, 1, 0 }
  0x18   : > { %p1251_p5 = pnand %p928_p13, %p1215_p3  ;;  %p1002_p7 = scmp.ne.s32.totalorder %s1533_s0, %s1001_s6 }
  0x19   : > { %p1008_p4 = scmp.lt.u32.totalorder %s1001_s6, %s1533_s0 }
  0x1a   : > { %p1003_p9 = pneg %p1251_p5 }
  0x1c   : > { %p1004_p11 = pnand %p1003_p9, %p1002_p7 }
  0x1e   : > { %p1005_p13 = pneg %p1004_p11 }
  0x20   : > { %p1010_p1 = pnand %p1008_p4, %p1005_p13 }
  0x22   : > { %1013 = shalt.err (!%p1010_p1)
}
  0x23   : > { %s1014_s11 = scalar_lea.vmem %s1243_s27, 512  ;;  %p1022_p6 = scmp.lt.s32.totalorder %s1243_s27, %s1243_s27 }
  0x24   : > { %p1015_p0 = scmp.ne.s32.totalorder %s1243_s27, %s1014_s11  ;;  %p1023_p3 = scmp.lt.s32.totalorder %s1014_s11, %s1014_s11 }
  0x26   : > { %p1017_p10 = pnand %p1015_p0, %p1003_p9  ;;  %p1024_p12 = por %p1023_p3, %p1022_p6 }
  0x28   : > { %p1018_p8 = pneg %p1017_p10 }
  0x2a   : > { %p1025_p2 = pnand %p1024_p12, %p1018_p8 }
  0x2c   : > { %1028 = shalt.err (!%p1025_p2)
}
  0x2d   : > { %s1148_s18 = smov 256   ;;  %s1149_s19 = smov 16  }
  0x2e   : > { %931 = dma.hbm_to_vmem [thread:$0]  (!%p1251_p5), %s1533_s0, 512, %s1243_s27, [#allocation4], %s1148_s18, %s1148_s18, %s1149_s19  }
  0x2f   : > { %p37_p10 = scmp.ge.s32.totalorder %s35_s30, 2  ;;  %s76_s4 = sadd.s32 1, %s1133_s14 }
  0x30   : > { %s186_s5 = sand.u32 1, %s1133_s14   ;;  %s790_s8 = sshll.u32 %s1141_s16, 9 }
  0x31   : > { %s1564_s30 = smov (%p37_p10, %s35_s30), 0  ;;  %s777_s6 = sshll.u32 %s186_s5, 10 }
  0x32   : > { %s72_s7 = ssub.s32 %s1141_s16, %s1564_s30  ;;  %s1293_s28 = scalar_lea.hbm %s1534_s1, %s790_s8 }
  0x33   : > { %p74_p3 = scmp.eq.s32.totalorder %s72_s7, 0  ;;  %s190_s27 = scalar_lea.vmem [#allocation6], %s777_s6 }
  0x34   : > { %s200_s11 = sshll.u32 %s190_s27, 4  ;;  %s1300_s19 = scalar_lea.sflag [#allocation7], %s186_s5  ;;  %s1298_s11 = int_to_ptr.vmem [resolvable:$true] %s200_s11 }
  0x35   : > { %s1296_s18 = scalar_select %p74_p3, %s1133_s14, %s76_s4  }
  0x36   : > { %s1029_s21 = scalar_lea.hbm %s1293_s28, 16384  ;;  %p1551_p8 = scmp.ne.s32.totalorder %s1550_s29, 0 }
  0x37   : > { %p1030_p6 = scmp.ne.s32.totalorder %s1293_s28, %s1029_s21  ;;  %s1034_s8 = scalar_lea.hbm %s1534_s1, 32768 }
  0x38   : > { %p1031_p12 = pneg %p1551_p8  ;;  %p1035_p2 = scmp.lt.u32.totalorder %s1293_s28, %s1534_s1 }
  0x39   : > { %p1036_p7 = scmp.lt.u32.totalorder %s1034_s8, %s1029_s21  ;;  %p1038_p11 = scmp.lt.u32.totalorder %s1029_s21, %s1293_s28 }
  0x3a   : > { %p1032_p0 = pnand %p1031_p12, %p1030_p6 }
  0x3b   : > { %p1037_p9 = por %p1036_p7, %p1035_p2 }
  0x3c   : > { %p1033_p5 = pneg %p1032_p0 }
  0x3d   : > { %p1039_p13 = por %p1038_p11, %p1037_p9 }
  0x3f   : > { %p1040_p4 = pnand %p1039_p13, %p1033_p5 }
  0x41   : > { %1043 = shalt.err (!%p1040_p4)
}
  0x42   : > { %s1044_s4 = scalar_lea.vmem %s1298_s11, 16384  ;;  %s1150_s5 = smov [#allocation6]  }
  0x43   : > { %p1045_p1 = scmp.ne.s32.totalorder %s1298_s11, %s1044_s4  ;;  %s1049_s10 = sshll.u32 %s1150_s5, 4  ;;  %s1050_s10 = int_to_ptr.vmem [resolvable:$false] %s1049_s10 }
  0x44   : > { %s1051_s27 = scalar_lea.vmem %s1050_s10, 32768  ;;  %p1052_p6 = scmp.lt.s32.totalorder %s1298_s11, %s1050_s10 }
  0x45   : > { %p1047_p10 = pnand %p1045_p1, %p1031_p12  ;;  %p1053_p0 = scmp.lt.s32.totalorder %s1051_s27, %s1044_s4 }
  0x47   : > { %p1048_p3 = pneg %p1047_p10  ;;  %p1054_p2 = por %p1053_p0, %p1052_p6 }
  0x49   : > { %p1055_p7 = pnand %p1054_p2, %p1048_p3 }
  0x4b   : > { %1058 = shalt.err (!%p1055_p7)
}
  0x4c   : > { %s1151_s21 = smov 1024   ;;  %s1152_s26 = smov 512  }
  0x4d   : > { %s1153_s7 = smov 32   ;;  %p1552_p12 = scmp.ne.s32.totalorder %s1548_s25, 0 }
  0x4e   : > { %935 = dma.hbm_to_vmem [thread:$0]  (!%p1551_p8), %s1293_s28, 16384, %s1298_s11, %s1300_s19, %s1151_s21, %s1152_s26, %s1153_s7  }
  0x4f   : > { %220 = sbr.rel (%p1552_p12) target bundleno = 395 (0x18b), region = 32  ;;  %p1553_p5 = scmp.ne.s32.totalorder (!%p1552_p12), %s1543_s20, 0 }
  0x56   : > { %1112 = dma.done.wait (%p1553_p5), [#allocation4], 512  }
  0x57   : > { %1114 = vsyncadd (%p1553_p5), [#allocation4], 4294966784  ;;  %s1335_s8 = sand.u32 1, %s1129_s13   ;;  %p1554_p8 = scmp.ne.s32.totalorder %s1545_s22, 0 }
  0x58   : > { %s782_s6 = sshll.u32 %s1335_s8, 10  ;;  %s227_s9 = scalar_lea.sflag [#allocation7], %s1335_s8 }
  0x59   : > { %s1339_s4 = scalar_lea.vmem [#allocation6], %s782_s6 }
  0x5a   : > { %1116 = dma.done.wait (%p1554_p8), %s227_s9, 16384  }
  0x5b   : > { %1118 = vsyncadd (%p1554_p8), %s227_s9, 4294950912  ;;  %v285_v0 = vld [vmem:[%s1339_s4 + $0x8] sm:$0xff]  ;;  %v287_v2 = vld [vmem:[%s1339_s4 + $0x18] sm:$0xff]  ;;  %s784_s20 = sshll.u32 %s1137_s15, 2  ;;  %s783_s28 = sshll.u32 %s1335_s8, 6 }
  0x5c   : > { %v289_v1 = vld [vmem:[%s1339_s4 + $0x28] sm:$0xff]  ;;  %v291_v4 = vld [vmem:[%s1339_s4 + $0x38] sm:$0xff]  ;;  %v284_v5 = vld [vmem:[%s1339_s4] sm:$0xff]  ;;  %p262_p9 = scmp.lt.s32.totalorder %s784_s20, 7  ;;  %s256_s11 = scalar_lea.vmem [#allocation8], %s783_s28 }
  0x5d   : > { %v792_v3 = vpack.c.bf16 %v289_v1, %v285_v0  ;;  %v288_v6 = vld [vmem:[%s1339_s4 + $0x20] sm:$0xff]  ;;  %v856_v7 = vpack.c.bf16 %v291_v4, %v287_v2  ;;  %v286_v9 = vld [vmem:[%s1339_s4 + $0x10] sm:$0xff]  ;;  %v293_v11 = vld [vmem:[%s1339_s4 + $0x48] sm:$0xff]  ;;  %s656_s19 = sshll.u32 %s256_s11, 4  ;;  %s791_s5 = sshll.u32 %s1137_s15, 9  ;;  %s1479_s19 = int_to_ptr.vmem [resolvable:$true] %s656_s19 }
  0x5e   : > { %v794_v8 = vpack.c.bf16 %v288_v6, %v284_v5  ;;  %v290_v10 = vld [vmem:[%s1339_s4 + $0x30] sm:$0xff]  ;;  %v297_v13 = vld [vmem:[%s1339_s4 + $0x68] sm:$0xff]  ;;  %v295_v14 = vld [vmem:[%s1339_s4 + $0x58] sm:$0xff]  ;;  %s1566_s20 = smov (!%p262_p9, %s784_s20), 7  ;;  %s1484_s15 = scalar_lea.hbm %s1536_s3, %s791_s5 }
  0x5f   : > { %793 = vmatprep.subr.bf16.mxu0 %v792_v3  ;;  %v858_v12 = vpack.c.bf16 %v290_v10, %v286_v9  ;;  %v299_v15 = vld [vmem:[%s1339_s4 + $0x78] sm:$0xff]  ;;  %857 = vmatprep.subr.bf16.mxu1 %v856_v7  ;;  %v796_v16 = vpack.c.bf16 %v297_v13, %v293_v11  ;;  %v292_v18 = vld [vmem:[%s1339_s4 + $0x40] sm:$0xff]  ;;  %v294_v20 = vld [vmem:[%s1339_s4 + $0x50] sm:$0xff]  ;;  %s264_s29 = scalar_lea.vmem %s1535_s2, %s1566_s20  ;;  %s640_s21 = scalar_lea.sflag [#allocation5], %s1335_s8 }
  0x60   : > { %795 = vmatpush1.bf16.msra.mxu0 %v794_v8  ;;  %v860_v17 = vpack.c.bf16 %v299_v15, %v295_v14  ;;  %v296_v19 = vld [vmem:[%s1339_s4 + $0x60] sm:$0xff]  ;;  %v298_v22 = vld [vmem:[%s1339_s4 + $0x70] sm:$0xff]  ;;  %v301_v23 = vld [vmem:[%s1339_s4 + $0x88] sm:$0xff]  ;;  %s1059_s26 = scalar_lea.vmem %s1479_s19, 1024  ;;  %p1555_p13 = scmp.ne.s32.totalorder %s1546_s23, 0 }
  0x61   : > { %859 = vmatpush1.bf16.msra.mxu1 %v858_v12  ;;  %v798_v21 = vpack.c.bf16 %v296_v19, %v292_v18  ;;  %v305_v24 = vld [vmem:[%s1339_s4 + $0xa8] sm:$0xff]  ;;  %797 = vmatprep.subr.bf16.mxu0 %v796_v16  ;;  %v862_v25 = vpack.c.bf16 %v298_v22, %v294_v20  ;;  %v303_v27 = vld [vmem:[%s1339_s4 + $0x98] sm:$0xff]  ;;  %v300_v29 = vld [vmem:[%s1339_s4 + $0x80] sm:$0xff]  ;;  %p1060_p11 = scmp.ne.s32.totalorder %s1479_s19, %s1059_s26  ;;  %s1154_s7 = smov [#allocation8]  }
  0x62   : > { %861 = vmatprep.subr.bf16.mxu1 %v860_v17  ;;  %v800_v26 = vpack.c.bf16 %v305_v24, %v301_v23  ;;  %v307_v28 = vld [vmem:[%s1339_s4 + $0xb8] sm:$0xff]  ;;  %v304_v31 = vld [vmem:[%s1339_s4 + $0xa0] sm:$0xff]  ;;  %v302_v32 = vld [vmem:[%s1339_s4 + $0x90] sm:$0xff]  ;;  %s1063_s6 = sshll.u32 %s1154_s7, 4  ;;  %s1064_s6 = int_to_ptr.vmem [resolvable:$false] %s1063_s6 }
  0x63   : > { %v864_v30 = vpack.c.bf16 %v307_v28, %v303_v27  ;;  %v306_v33 = vld [vmem:[%s1339_s4 + $0xb0] sm:$0xff]  ;;  %v802_v34 = vpack.c.bf16 %v304_v31, %v300_v29  ;;  %v309_v35 = vld [vmem:[%s1339_s4 + $0xc8] sm:$0xff]  ;;  %v311_v37 = vld [vmem:[%s1339_s4 + $0xd8] sm:$0xff]  ;;  %p1061_p4 = pnand %p1060_p11, %p1555_p13  ;;  %s1065_s9 = scalar_lea.vmem %s1064_s6, 2048 }
  0x64   : > { %799 = vmatpush1.bf16.msra.mxu0 %v798_v21  ;;  %v313_v36 = vld [vmem:[%s1339_s4 + $0xe8] sm:$0xff]  ;;  %v866_v38 = vpack.c.bf16 %v306_v33, %v302_v32  ;;  %v315_v40 = vld [vmem:[%s1339_s4 + $0xf8] sm:$0xff]  ;;  %v308_v41 = vld [vmem:[%s1339_s4 + $0xc0] sm:$0xff]  ;;  %p1066_p10 = scmp.lt.s32.totalorder %s1479_s19, %s1064_s6  ;;  %p1067_p3 = scmp.lt.s32.totalorder %s1065_s9, %s1059_s26 }
  0x65   : > { %863 = vmatpush1.bf16.msra.mxu1 %v862_v25  ;;  %801 = vmatprep.subr.bf16.mxu0 %v800_v26  ;;  %v804_v39 = vpack.c.bf16 %v313_v36, %v309_v35  ;;  %v312_v42 = vld [vmem:[%s1339_s4 + $0xe0] sm:$0xff]  ;;  %v868_v43 = vpack.c.bf16 %v315_v40, %v311_v37  ;;  %v310_v44 = vld [vmem:[%s1339_s4 + $0xd0] sm:$0xff]  ;;  %v317_v46 = vld [vmem:[%s1339_s4 + $0x108] sm:$0xff]  ;;  %p1062_p1 = pneg %p1061_p4 }
  0x66   : > { %865 = vmatprep.subr.bf16.mxu1 %v864_v30  ;;  %v314_v45 = vld [vmem:[%s1339_s4 + $0xf0] sm:$0xff]  ;;  %v321_v47 = vld [vmem:[%s1339_s4 + $0x128] sm:$0xff]  ;;  %v319_v48 = vld [vmem:[%s1339_s4 + $0x118] sm:$0xff]  ;;  %v806_v50 = vpack.c.bf16 %v312_v42, %v308_v41  ;;  %p1068_p6 = por %p1067_p3, %p1066_p10 }
  0x67   : > { %v323_v49 = vld [vmem:[%s1339_s4 + $0x138] sm:$0xff]  ;;  %v870_v51 = vpack.c.bf16 %v314_v45, %v310_v44  ;;  %v808_v52 = vpack.c.bf16 %v321_v47, %v317_v46  ;;  %v316_v53 = vld [vmem:[%s1339_s4 + $0x100] sm:$0xff]  ;;  %v318_v55 = vld [vmem:[%s1339_s4 + $0x110] sm:$0xff] }
  0x68   : > { %803 = vmatpush1.bf16.msra.mxu0 %v802_v34  ;;  %v320_v54 = vld [vmem:[%s1339_s4 + $0x120] sm:$0xff]  ;;  %v872_v56 = vpack.c.bf16 %v323_v49, %v319_v48  ;;  %v322_v57 = vld [vmem:[%s1339_s4 + $0x130] sm:$0xff]  ;;  %v325_v58 = vld [vmem:[%s1339_s4 + $0x148] sm:$0xff]  ;;  %p1069_p0 = pnand %p1068_p6, %p1062_p1 }
  0x69   : > { %867 = vmatpush1.bf16.msra.mxu1 %v866_v38  ;;  %805 = vmatprep.subr.bf16.mxu0 %v804_v39  ;;  %v329_v59 = vld [vmem:[%s1339_s4 + $0x168] sm:$0xff]  ;;  %v327_v60 = vld [vmem:[%s1339_s4 + $0x158] sm:$0xff]  ;;  %v810_v62 = vpack.c.bf16 %v320_v54, %v316_v53  ;;  %v874_v63 = vpack.c.bf16 %v322_v57, %v318_v55  ;;  %v324_v1 = vld [vmem:[%s1339_s4 + $0x140] sm:$0xff] }
  0x6a   : > { %869 = vmatprep.subr.bf16.mxu1 %v868_v43  ;;  %v331_v61 = vld [vmem:[%s1339_s4 + $0x178] sm:$0xff]  ;;  %v812_v0 = vpack.c.bf16 %v329_v59, %v325_v58  ;;  %v328_v2 = vld [vmem:[%s1339_s4 + $0x160] sm:$0xff]  ;;  %v326_v3 = vld [vmem:[%s1339_s4 + $0x150] sm:$0xff] }
  0x6b   : > { %v876_v4 = vpack.c.bf16 %v331_v61, %v327_v60  ;;  %v330_v5 = vld [vmem:[%s1339_s4 + $0x170] sm:$0xff]  ;;  %v333_v6 = vld [vmem:[%s1339_s4 + $0x188] sm:$0xff]  ;;  %v335_v8 = vld [vmem:[%s1339_s4 + $0x198] sm:$0xff]  ;;  %v814_v10 = vpack.c.bf16 %v328_v2, %v324_v1 }
  0x6c   : > { %807 = vmatpush1.bf16.msra.mxu0 %v806_v50  ;;  %v337_v7 = vld [vmem:[%s1339_s4 + $0x1a8] sm:$0xff]  ;;  %v339_v9 = vld [vmem:[%s1339_s4 + $0x1b8] sm:$0xff]  ;;  %v878_v11 = vpack.c.bf16 %v330_v5, %v326_v3  ;;  %v332_v13 = vld [vmem:[%s1339_s4 + $0x180] sm:$0xff] }
  0x6d   : > { %871 = vmatpush1.bf16.msra.mxu1 %v870_v51  ;;  %809 = vmatprep.subr.bf16.mxu0 %v808_v52  ;;  %v816_v12 = vpack.c.bf16 %v337_v7, %v333_v6  ;;  %v336_v14 = vld [vmem:[%s1339_s4 + $0x1a0] sm:$0xff]  ;;  %v334_v15 = vld [vmem:[%s1339_s4 + $0x190] sm:$0xff]  ;;  %v880_v16 = vpack.c.bf16 %v339_v9, %v335_v8  ;;  %v341_v18 = vld [vmem:[%s1339_s4 + $0x1c8] sm:$0xff] }
  0x6e   : > { %873 = vmatprep.subr.bf16.mxu1 %v872_v56  ;;  %v338_v17 = vld [vmem:[%s1339_s4 + $0x1b0] sm:$0xff]  ;;  %v345_v19 = vld [vmem:[%s1339_s4 + $0x1e8] sm:$0xff]  ;;  %v343_v20 = vld [vmem:[%s1339_s4 + $0x1d8] sm:$0xff]  ;;  %v818_v22 = vpack.c.bf16 %v336_v14, %v332_v13 }
  0x6f   : > { %v347_v21 = vld [vmem:[%s1339_s4 + $0x1f8] sm:$0xff]  ;;  %v882_v23 = vpack.c.bf16 %v338_v17, %v334_v15  ;;  %v820_v24 = vpack.c.bf16 %v345_v19, %v341_v18  ;;  %v340_v25 = vld [vmem:[%s1339_s4 + $0x1c0] sm:$0xff]  ;;  %v342_v27 = vld [vmem:[%s1339_s4 + $0x1d0] sm:$0xff] }
  0x70   : > { %811 = vmatpush1.bf16.msra.mxu0 %v810_v62  ;;  %v344_v26 = vld [vmem:[%s1339_s4 + $0x1e0] sm:$0xff]  ;;  %v884_v28 = vpack.c.bf16 %v347_v21, %v343_v20  ;;  %v346_v29 = vld [vmem:[%s1339_s4 + $0x1f0] sm:$0xff]  ;;  %v349_v30 = vld [vmem:[%s1339_s4 + $0x208] sm:$0xff] }
  0x71   : > { %875 = vmatpush1.bf16.msra.mxu1 %v874_v63  ;;  %813 = vmatprep.subr.bf16.mxu0 %v812_v0  ;;  %v353_v31 = vld [vmem:[%s1339_s4 + $0x228] sm:$0xff]  ;;  %v351_v32 = vld [vmem:[%s1339_s4 + $0x218] sm:$0xff]  ;;  %v822_v34 = vpack.c.bf16 %v344_v26, %v340_v25  ;;  %v886_v35 = vpack.c.bf16 %v346_v29, %v342_v27  ;;  %v348_v37 = vld [vmem:[%s1339_s4 + $0x200] sm:$0xff] }
  0x72   : > { %877 = vmatprep.subr.bf16.mxu1 %v876_v4  ;;  %v355_v33 = vld [vmem:[%s1339_s4 + $0x238] sm:$0xff]  ;;  %v824_v36 = vpack.c.bf16 %v353_v31, %v349_v30  ;;  %v352_v38 = vld [vmem:[%s1339_s4 + $0x220] sm:$0xff]  ;;  %v350_v39 = vld [vmem:[%s1339_s4 + $0x210] sm:$0xff] }
  0x73   : > { %v888_v40 = vpack.c.bf16 %v355_v33, %v351_v32  ;;  %v354_v41 = vld [vmem:[%s1339_s4 + $0x230] sm:$0xff]  ;;  %v357_v42 = vld [vmem:[%s1339_s4 + $0x248] sm:$0xff]  ;;  %v359_v44 = vld [vmem:[%s1339_s4 + $0x258] sm:$0xff]  ;;  %v826_v46 = vpack.c.bf16 %v352_v38, %v348_v37 }
  0x74   : > { %815 = vmatpush1.bf16.msra.mxu0 %v814_v10  ;;  %v361_v43 = vld [vmem:[%s1339_s4 + $0x268] sm:$0xff]  ;;  %v363_v45 = vld [vmem:[%s1339_s4 + $0x278] sm:$0xff]  ;;  %v890_v47 = vpack.c.bf16 %v354_v41, %v350_v39  ;;  %v356_v49 = vld [vmem:[%s1339_s4 + $0x240] sm:$0xff] }
  0x75   : > { %879 = vmatpush1.bf16.msra.mxu1 %v878_v11  ;;  %817 = vmatprep.subr.bf16.mxu0 %v816_v12  ;;  %v828_v48 = vpack.c.bf16 %v361_v43, %v357_v42  ;;  %v360_v50 = vld [vmem:[%s1339_s4 + $0x260] sm:$0xff]  ;;  %v358_v51 = vld [vmem:[%s1339_s4 + $0x250] sm:$0xff]  ;;  %v892_v52 = vpack.c.bf16 %v363_v45, %v359_v44  ;;  %v365_v54 = vld [vmem:[%s1339_s4 + $0x288] sm:$0xff] }
  0x76   : > { %881 = vmatprep.subr.bf16.mxu1 %v880_v16  ;;  %v362_v53 = vld [vmem:[%s1339_s4 + $0x270] sm:$0xff]  ;;  %v369_v55 = vld [vmem:[%s1339_s4 + $0x2a8] sm:$0xff]  ;;  %v367_v56 = vld [vmem:[%s1339_s4 + $0x298] sm:$0xff]  ;;  %v830_v58 = vpack.c.bf16 %v360_v50, %v356_v49 }
  0x77   : > { %v371_v57 = vld [vmem:[%s1339_s4 + $0x2b8] sm:$0xff]  ;;  %v894_v59 = vpack.c.bf16 %v362_v53, %v358_v51  ;;  %v832_v60 = vpack.c.bf16 %v369_v55, %v365_v54  ;;  %v364_v61 = vld [vmem:[%s1339_s4 + $0x280] sm:$0xff]  ;;  %v366_v63 = vld [vmem:[%s1339_s4 + $0x290] sm:$0xff] }
  0x78   : > { %819 = vmatpush1.bf16.msra.mxu0 %v818_v22  ;;  %v368_v62 = vld [vmem:[%s1339_s4 + $0x2a0] sm:$0xff]  ;;  %v896_v0 = vpack.c.bf16 %v371_v57, %v367_v56  ;;  %v370_v1 = vld [vmem:[%s1339_s4 + $0x2b0] sm:$0xff]  ;;  %v373_v2 = vld [vmem:[%s1339_s4 + $0x2c8] sm:$0xff] }
  0x79   : > { %883 = vmatpush1.bf16.msra.mxu1 %v882_v23  ;;  %821 = vmatprep.subr.bf16.mxu0 %v820_v24  ;;  %v377_v3 = vld [vmem:[%s1339_s4 + $0x2e8] sm:$0xff]  ;;  %v375_v4 = vld [vmem:[%s1339_s4 + $0x2d8] sm:$0xff]  ;;  %v834_v6 = vpack.c.bf16 %v368_v62, %v364_v61  ;;  %v372_v7 = vld [vmem:[%s1339_s4 + $0x2c0] sm:$0xff]  ;;  %v898_v8 = vpack.c.bf16 %v370_v1, %v366_v63 }
  0x7a   : > { %885 = vmatprep.subr.bf16.mxu1 %v884_v28  ;;  %v379_v5 = vld [vmem:[%s1339_s4 + $0x2f8] sm:$0xff]  ;;  %v836_v9 = vpack.c.bf16 %v377_v3, %v373_v2  ;;  %v376_v10 = vld [vmem:[%s1339_s4 + $0x2e0] sm:$0xff]  ;;  %v374_v11 = vld [vmem:[%s1339_s4 + $0x2d0] sm:$0xff] }
  0x7b   : > { %v378_v12 = vld [vmem:[%s1339_s4 + $0x2f0] sm:$0xff]  ;;  %v900_v13 = vpack.c.bf16 %v379_v5, %v375_v4  ;;  %v381_v14 = vld [vmem:[%s1339_s4 + $0x308] sm:$0xff]  ;;  %v383_v17 = vld [vmem:[%s1339_s4 + $0x318] sm:$0xff]  ;;  %v838_v19 = vpack.c.bf16 %v376_v10, %v372_v7  ;;  %v603_v4 = vlaneseq }
  0x7c   : > { %823 = vmatpush1.bf16.msra.mxu0 %v822_v34  ;;  %v385_v15 = vld [vmem:[%s1339_s4 + $0x328] sm:$0xff]  ;;  %v387_v18 = vld [vmem:[%s1339_s4 + $0x338] sm:$0xff]  ;;  %v902_v20 = vpack.c.bf16 %v378_v12, %v374_v11  ;;  %v380_v22 = vld [vmem:[%s1339_s4 + $0x300] sm:$0xff] }
  0x7d   : > { %887 = vmatpush1.bf16.msra.mxu1 %v886_v35  ;;  %825 = vmatprep.subr.bf16.mxu0 %v824_v36  ;;  %v281_v16 = vld [vmem:[#allocation3 + $0x8] sm:$0xff]  ;;  %v840_v21 = vpack.c.bf16 %v385_v15, %v381_v14  ;;  %v384_v23 = vld [vmem:[%s1339_s4 + $0x320] sm:$0xff]  ;;  %v382_v24 = vld [vmem:[%s1339_s4 + $0x310] sm:$0xff]  ;;  %v904_v25 = vpack.c.bf16 %v387_v18, %v383_v17  ;;  %v604_v5 = vshrl.u32 %v603_v4, 7 }
  0x7e   : > { %889 = vmatprep.subr.bf16.mxu1 %v888_v40  ;;  %484 = vmatprep.mubr.f32.mxu0 %v281_v16  ;;  %v386_v26 = vld [vmem:[%s1339_s4 + $0x330] sm:$0xff]  ;;  %v389_v27 = vld [vmem:[%s1339_s4 + $0x348] sm:$0xff]  ;;  %v391_v29 = vld [vmem:[%s1339_s4 + $0x358] sm:$0xff]  ;;  %v842_v31 = vpack.c.bf16 %v384_v23, %v380_v22 }
  0x7f   : > { %561 = vmatprep.mubr.f32.mxu1 %v281_v16  ;;  %v393_v28 = vld [vmem:[%s1339_s4 + $0x368] sm:$0xff]  ;;  %v395_v30 = vld [vmem:[%s1339_s4 + $0x378] sm:$0xff]  ;;  %v906_v32 = vpack.c.bf16 %v386_v26, %v382_v24  ;;  %v388_v34 = vld [vmem:[%s1339_s4 + $0x340] sm:$0xff]  ;;  %v617_v10 = vsub.s32 3, %v604_v5 }
  0x80   : > { %827 = vmatpush1.bf16.msra.mxu0 %v826_v46  ;;  %v844_v33 = vpack.c.bf16 %v393_v28, %v389_v27  ;;  %v392_v35 = vld [vmem:[%s1339_s4 + $0x360] sm:$0xff]  ;;  %v390_v36 = vld [vmem:[%s1339_s4 + $0x350] sm:$0xff]  ;;  %v908_v37 = vpack.c.bf16 %v395_v30, %v391_v29  ;;  %v397_v39 = vld [vmem:[%s1339_s4 + $0x388] sm:$0xff] }
  0x81   : > { %891 = vmatpush1.bf16.msra.mxu1 %v890_v47  ;;  %829 = vmatprep.subr.bf16.mxu0 %v828_v48  ;;  %v394_v38 = vld [vmem:[%s1339_s4 + $0x370] sm:$0xff]  ;;  %v401_v40 = vld [vmem:[%s1339_s4 + $0x3a8] sm:$0xff]  ;;  %v399_v41 = vld [vmem:[%s1339_s4 + $0x398] sm:$0xff]  ;;  %v846_v43 = vpack.c.bf16 %v392_v35, %v388_v34 }
  0x82   : > { %893 = vmatprep.subr.bf16.mxu1 %v892_v52  ;;  %v403_v42 = vld [vmem:[%s1339_s4 + $0x3b8] sm:$0xff]  ;;  %v910_v44 = vpack.c.bf16 %v394_v38, %v390_v36  ;;  %v848_v45 = vpack.c.bf16 %v401_v40, %v397_v39  ;;  %v396_v46 = vld [vmem:[%s1339_s4 + $0x380] sm:$0xff]  ;;  %v398_v48 = vld [vmem:[%s1339_s4 + $0x390] sm:$0xff] }
  0x83   : > { %v400_v47 = vld [vmem:[%s1339_s4 + $0x3a0] sm:$0xff]  ;;  %v912_v49 = vpack.c.bf16 %v403_v42, %v399_v41  ;;  %v402_v50 = vld [vmem:[%s1339_s4 + $0x3b0] sm:$0xff]  ;;  %v405_v51 = vld [vmem:[%s1339_s4 + $0x3c8] sm:$0xff] }
  0x84   : > { %831 = vmatpush1.bf16.msra.mxu0 %v830_v58  ;;  %v409_v52 = vld [vmem:[%s1339_s4 + $0x3e8] sm:$0xff]  ;;  %v407_v53 = vld [vmem:[%s1339_s4 + $0x3d8] sm:$0xff]  ;;  %v850_v55 = vpack.c.bf16 %v400_v47, %v396_v46  ;;  %v914_v56 = vpack.c.bf16 %v402_v50, %v398_v48  ;;  %v404_v58 = vld [vmem:[%s1339_s4 + $0x3c0] sm:$0xff] }
  0x85   : > { %895 = vmatpush1.bf16.msra.mxu1 %v894_v59  ;;  %833 = vmatprep.subr.bf16.mxu0 %v832_v60  ;;  %v411_v54 = vld [vmem:[%s1339_s4 + $0x3f8] sm:$0xff]  ;;  %v852_v57 = vpack.c.bf16 %v409_v52, %v405_v51  ;;  %v408_v59 = vld [vmem:[%s1339_s4 + $0x3e0] sm:$0xff]  ;;  %v406_v61 = vld [vmem:[%s1339_s4 + $0x3d0] sm:$0xff] }
  0x86   : > { %897 = vmatprep.subr.bf16.mxu1 %v896_v0  ;;  %v916_v60 = vpack.c.bf16 %v411_v54, %v407_v53  ;;  %v410_v62 = vld [vmem:[%s1339_s4 + $0x3f0] sm:$0xff]  ;;  %v854_v63 = vpack.c.bf16 %v408_v59, %v404_v58  ;;  %v280_v1 = vld [vmem:[#allocation3] sm:$0xff]  ;;  %v283_v2 = vld [vmem:[#allocation3 + $0x18] sm:$0xff] }
  0x87   : > { %v918_v0 = vpack.c.bf16 %v410_v62, %v406_v61  ;;  %v282_v3 = vld [vmem:[#allocation3 + $0x10] sm:$0xff]  ;;  %v601_v7 = vld [vmem:[%s264_s29] sm:$0xf] }
  0x88   : > { %835 = vmatpush1.bf16.msra.mxu0 %v834_v6  ;;  %v605_v6 = vsub.s32 0, %v604_v5  ;;  %v618_v14 = vrot.slane %v601_v7, %v617_v10 }
  0x89   : > { %899 = vmatpush1.bf16.msra.mxu1 %v898_v8  ;;  %837 = vmatprep.subr.bf16.mxu0 %v836_v9  ;;  %v613_v8 = vsub.s32 2, %v604_v5  ;;  %v609_v9 = vsub.s32 1, %v604_v5 }
  0x8a   : > { %901 = vmatprep.subr.bf16.mxu1 %v900_v13  ;;  %v606_v11 = vrot.slane %v601_v7, %v605_v6 }
  0x8b   : > { %v614_v12 = vrot.slane %v601_v7, %v613_v8  ;;  %v610_v13 = vrot.slane %v601_v7, %v609_v9 }
  0x8c   : > { %839 = vmatpush1.bf16.msra.mxu0 %v838_v19 }
  0x8d   : > { %903 = vmatpush1.bf16.msra.mxu1 %v902_v20  ;;  %841 = vmatprep.subr.bf16.mxu0 %v840_v21 }
  0x8e   : > { %905 = vmatprep.subr.bf16.mxu1 %v904_v25 }
  0x90   : > { %843 = vmatpush1.bf16.msra.mxu0 %v842_v31 }
  0x91   : > { %907 = vmatpush1.bf16.msra.mxu1 %v906_v32  ;;  %845 = vmatprep.subr.bf16.mxu0 %v844_v33 }
  0x92   : > { %909 = vmatprep.subr.bf16.mxu1 %v908_v37 }
  0x94   : > { %847 = vmatpush1.bf16.msra.mxu0 %v846_v43 }
  0x95   : > { %911 = vmatpush1.bf16.msra.mxu1 %v910_v44  ;;  %849 = vmatprep.subr.bf16.mxu0 %v848_v45 }
  0x96   : > { %913 = vmatprep.subr.bf16.mxu1 %v912_v49 }
  0x98   : > { %851 = vmatpush1.bf16.msra.mxu0 %v850_v55 }
  0x99   : > { %915 = vmatpush1.bf16.msra.mxu1 %v914_v56  ;;  %853 = vmatprep.subr.bf16.mxu0 %v852_v57 }
  0x9a   : > { %917 = vmatprep.subr.bf16.mxu1 %v916_v60 }
  0x9c   : > { %855 = vmatpush1.bf16.msra.mxu0 %v854_v63 }
  0x9d   : > { %919 = vmatpush1.bf16.msra.mxu1 %v918_v0 }
  0x9f   : > { %485 = vmatmul.mubr.f32.vlgmr.msra.gmra.mrb[0].mxu0 %v280_v1 }
  0xa0   : > { %562 = vmatmul.mubr.f32.vlgmr.msra.gmra.mrb[0].mxu1 %v280_v1  ;;  %490 = vmatprep.mubr.f32.mxu0 %v283_v2 }
  0xa1   : > { %567 = vmatprep.mubr.f32.mxu1 %v283_v2 }
  0xa3   : > { %491 = vmatmul.mubr.f32.gmra.mrb[2].mxu0 %v282_v3 }
  0xa4   : > { %568 = vmatmul.mubr.f32.gmra.mrb[2].mxu1 %v282_v3 }
 0x172   : > { %v486_v15 = vpop.f32.mrb[0].mxu0 }
 0x173   : > { %v623_v16 = vadd.f32 %v606_v11, %v486_v15  ;;  %v563_v17 = vpop.f32.mrb[0].mxu1  ;;  %v488_v18 = vpop.f32.mrb[1].mxu0 }
 0x174   : > { %v625_v19 = vadd.f32 %v614_v12, %v563_v17  ;;  %v624_v20 = vadd.f32 %v610_v13, %v488_v18  ;;  %v565_v21 = vpop.f32.mrb[1].mxu1 }
 0x175   : > { %631 = vst [vmem:[%s256_s11] sm:$0xff] %v623_v16  ;;  %v626_v22 = vadd.f32 %v618_v14, %v565_v21 }
 0x176   : > { %633 = vst [vmem:[%s256_s11 + $0x10] sm:$0xff] %v625_v19  ;;  %632 = vst [vmem:[%s256_s11 + $0x8] sm:$0xff] %v624_v20  ;;  %v492_v23 = vpop.f32.mrb[2].mxu0 }
 0x177   : > { %634 = vst [vmem:[%s256_s11 + $0x18] sm:$0xff] %v626_v22  ;;  %v627_v24 = vadd.f32 %v606_v11, %v492_v23  ;;  %v569_v25 = vpop.f32.mrb[2].mxu1  ;;  %v494_v26 = vpop.f32.mrb[3].mxu0 }
 0x178   : > { %v629_v27 = vadd.f32 %v614_v12, %v569_v25  ;;  %v628_v28 = vadd.f32 %v610_v13, %v494_v26  ;;  %v571_v29 = vpop.f32.mrb[3].mxu1 }
 0x179   : > { %635 = vst [vmem:[%s256_s11 + $0x20] sm:$0xff] %v627_v24  ;;  %v630_v30 = vadd.f32 %v618_v14, %v571_v29 }
 0x17a   : > { %637 = vst [vmem:[%s256_s11 + $0x30] sm:$0xff] %v629_v27  ;;  %636 = vst [vmem:[%s256_s11 + $0x28] sm:$0xff] %v628_v28 }
 0x17b   : > { %638 = vst [vmem:[%s256_s11 + $0x38] sm:$0xff] %v630_v30 }
 0x17c   : > { %1072 = shalt.err (!%p1069_p0)
}
 0x17d   : > { %s1073_s4 = scalar_lea.hbm %s1484_s15, 1024  ;;  %s1077_s25 = scalar_lea.hbm %s1536_s3, 2048 }
 0x17e   : > { %p1074_p2 = scmp.ne.s32.totalorder %s1484_s15, %s1073_s4  ;;  %p1078_p5 = scmp.lt.u32.totalorder %s1484_s15, %s1536_s3 }
 0x17f   : > { %p1079_p8 = scmp.lt.u32.totalorder %s1077_s25, %s1073_s4  ;;  %p1081_p11 = scmp.lt.u32.totalorder %s1073_s4, %s1484_s15 }
 0x180   : > { %p1075_p7 = pnand %p1074_p2, %p1555_p13 }
 0x181   : > { %p1080_p9 = por %p1079_p8, %p1078_p5 }
 0x182   : > { %p1076_p12 = pneg %p1075_p7 }
 0x183   : > { %p1082_p4 = por %p1081_p11, %p1080_p9 }
 0x185   : > { %p1083_p1 = pnand %p1082_p4, %p1076_p12 }
 0x187   : > { %1086 = shalt.err (!%p1083_p1)
}
 0x188   : > { %s1155_s11 = smov 512   ;;  %s1156_s5 = smov 1024  }
 0x189   : > { %s1157_s10 = smov 32  }
 0x18a   : > { %926 = dma.vmem_to_hbm [thread:$0]  (%p1555_p13), %s1479_s19, 1024, %s1484_s15, %s640_s21, %s1155_s11, %s1156_s5, %s1157_s10  }
 0x18b PF: > { %s671_s27 = sand.u32 1, %s1125_s12   ;;  %p1556_p10 = scmp.ne.s32.totalorder %s1547_s24, 0 }
 0x18c   : > { %p1557_p3 = scmp.ge.s32.totalorder %s1145_s17, 2  ;;  %s672_s26 = scalar_lea.sflag [#allocation5], %s671_s27 }
 0x18e   : > { %p937_p6 = pnand %p1557_p3, %p1556_p10 }
 0x190   : > { %1120 = dma.done.wait (!%p937_p6), %s672_s26, 1024  }
 0x191   : > { %1122 = vsyncadd (!%p937_p6), %s672_s26, 4294966272  ;;  %s20_s17 = sadd.s32 1, %s1145_s17   ;;  %s1558_s12 = smov %s1129_s13 }
 0x192   : > { %p17_p0 = scmp.ge.s32.totalorder %s20_s17, 4   ;;  %s1559_s13 = smov %s1133_s14 }
 0x193   : > { %s1560_s14 = smov %s1296_s18  ;;  %s1561_s15 = smov %s1141_s16 }
 0x194   : > { %s1562_s16 = smov %s1564_s30  ;;  %19 = sbr.rel (!%p17_p0) target bundleno = 7 (0x7), region = 94 }
 0x19b   :  { %677 = vsyncpa [#allocation4], 1 }
 0x19c   :  { %679 = vsyncpa [#allocation4 + $0x1], 1 }
 0x19d   :  { %680 = vsyncpa [#allocation7], 1 }
 0x19e   :  { %682 = vsyncpa [#allocation7 + $0x1], 1 }
 0x19f   :  { %683 = vsyncpa [#allocation5], 1 }
 0x1a0   :  { %685 = vsyncpa [#allocation5 + $0x1], 1 }

</bundles_post_ra>
